<compile_context>
chip_gen: v7x
topology: tpu7x:2x2x1
jax: 0.10.0
libtpu: 0.0.40
codegen_flags: <defaults>
</compile_context>

<pallas_src>
import functools
from typing import NamedTuple

import numpy as np
import jax
import jax.numpy as jnp
from jax.experimental import pallas as pl
from jax.experimental.pallas import tpu as pltpu

_MIB = 1024 * 1024
_VMEM_LIMIT_BYTES = 32 * _MIB        # explicit scoped-VMEM limit (ok on v5e/v6e/v7x)
_VMEM_BUDGET_BYTES = 22 * _MIB       # conservative footprint budget (v7x: 64 MiB phys)
_SUPPORT_RESIDENT_BUDGET = 12 * _MIB  # max bytes for a fully VMEM-resident support


# --------------------------------------------------------------------------
# Stage 1: support = features @ W  (computed exactly once; bf16 output)
# --------------------------------------------------------------------------
def _support_kernel(feat_ref, w_ref, out_ref):
    out_ref[...] = jnp.dot(
        feat_ref[...].astype(jnp.bfloat16),
        w_ref[...].astype(jnp.bfloat16),
        preferred_element_type=jnp.float32,
    ).astype(out_ref.dtype)


def _support_matmul(features, weight):
    n, f_in = features.shape
    f_out = weight.shape[1]
    # K = f_in is tiny, so per-step overhead dominates unless each step covers
    # many rows: use a large row tile and keep W resident (constant index_map).
    sm = next((c for c in (4096, 2048, 1024, 512, 256, 128) if n % c == 0), n)
    return pl.pallas_call(
        _support_kernel,
        out_shape=jax.ShapeDtypeStruct((n, f_out), jnp.bfloat16),
        grid_spec=pltpu.PrefetchScalarGridSpec(
            num_scalar_prefetch=0,
            grid=(n // sm,),
            in_specs=[
                pl.BlockSpec((sm, f_in), lambda i: (i, 0)),
                pl.BlockSpec((f_in, f_out), lambda i: (0, 0)),
            ],
            out_specs=pl.BlockSpec((sm, f_out), lambda i: (i, 0)),
        ),
        compiler_params=pltpu.CompilerParams(
            dimension_semantics=("parallel",),
            vmem_limit_bytes=_VMEM_LIMIT_BYTES),
    )(features, weight)


# --------------------------------------------------------------------------
# Stage 2a: dense aggregation  out = [relu](adj @ support)
# --------------------------------------------------------------------------
def _aggregate_dense_kernel(adj_ref, sup_ref, out_ref, *, tk, active,
                            sup_resident):
    k = pl.program_id(1)

    @pl.when(k == 0)
    def _():
        out_ref[...] = jnp.zeros_like(out_ref)

    # adj streamed in native dtype; cast to bf16 in VMEM (no extra HBM pass).
    adj_tile = adj_ref[...].astype(jnp.bfloat16)
    if sup_resident:
        sup_tile = sup_ref[pl.ds(pl.multiple_of(k * tk, tk), tk), :]
    else:
        sup_tile = sup_ref[...]
    out_ref[...] += jnp.dot(adj_tile, sup_tile,
                            preferred_element_type=jnp.float32)

    if active:
        @pl.when(k == pl.num_programs(1) - 1)
        def _():
            out_ref[...] = jnp.maximum(out_ref[...], 0.0)


def _aggregate_dense(adj, support_bf, *, tm, tk, active, sup_resident):
    n = adj.shape[0]
    f_out = support_bf.shape[1]
    kernel = functools.partial(_aggregate_dense_kernel, tk=tk, active=active,
                               sup_resident=sup_resident)
    if sup_resident:
        # Fetched once (constant block index), then sliced per reduction step.
        sup_spec = pl.BlockSpec((n, f_out), lambda i, k: (0, 0))
    else:
        sup_spec = pl.BlockSpec((tk, f_out), lambda i, k: (k, 0))
    return pl.pallas_call(
        kernel,
        out_shape=jax.ShapeDtypeStruct((n, f_out), jnp.float32),
        grid_spec=pltpu.PrefetchScalarGridSpec(
            num_scalar_prefetch=0,
            grid=(n // tm, n // tk),
            in_specs=[pl.BlockSpec((tm, tk), lambda i, k: (i, k)), sup_spec],
            out_specs=pl.BlockSpec((tm, f_out), lambda i, k: (i, 0)),
        ),
        compiler_params=pltpu.CompilerParams(
            dimension_semantics=("parallel", "arbitrary"),
            vmem_limit_bytes=_VMEM_LIMIT_BYTES),
    )(adj, support_bf)


# --------------------------------------------------------------------------
# Stage 2b: block-sparse aggregation (per-graph precomputed block structure)
# --------------------------------------------------------------------------
class BlockStructure(NamedTuple):
    rows: jax.Array     # (num_groups * steps,) int32 row-block per step
    cols: jax.Array     # (num_groups * steps,) int32 col-block per step
    valid: jax.Array    # (num_groups * steps,) int32, 0 = padding entry
    num_groups: int
    steps: int
    tm: int
    tk: int
    nz_frac: float


def precompute_block_structure(adj, tm, tk, *, num_groups=2):
    """Enumerate nonzero (row-block, col-block) pairs of adj ONCE per graph.

    The graph is fixed for a GCN, so call this once and reuse across layers /
    steps (it syncs adj to host).  Rows within a group are contiguous per row
    block by construction, which the kernel's init/finalize logic relies on.
    """
    adj_np = np.asarray(adj)
    n = adj_np.shape[0]
    assert adj_np.shape == (n, n) and n % tm == 0 and n % tk == 0
    nbr, nbc = n // tm, n // tk
    mask = np.any(adj_np.reshape(nbr, tm, nbc, tk) != 0.0, axis=(1, 3))

    per_row = []
    for i in range(nbr):
        nz = np.nonzero(mask[i])[0]
        if nz.size == 0:
            nz = np.array([0], dtype=np.int64)  # zero block keeps output initialized
        per_row.append(nz)

    num_groups = max(1, min(num_groups, nbr))
    groups = [[] for _ in range(num_groups)]
    counts = np.zeros(num_groups, np.int64)
    for i in range(nbr):           # balance counts; each row block in ONE group
        g = int(np.argmin(counts))
        groups[g].extend((i, int(c)) for c in per_row[i])
        counts[g] += per_row[i].size

    steps = max(len(g) for g in groups)
    rows = np.zeros((num_groups, steps), np.int32)
    cols = np.zeros((num_groups, steps), np.int32)
    valid = np.zeros((num_groups, steps), np.int32)
    for g, entries in enumerate(groups):
        for b, (r, c) in enumerate(entries):
            rows[g, b], cols[g, b], valid[g, b] = r, c, 1
        r, c = entries[-1]
        rows[g, len(entries):] = r       # padding repeats last entry, valid=0
        cols[g, len(entries):] = c
    return BlockStructure(jnp.asarray(rows.reshape(-1)),
                          jnp.asarray(cols.reshape(-1)),
                          jnp.asarray(valid.reshape(-1)),
                          num_groups, steps, tm, tk, float(mask.mean()))


def _aggregate_sparse_kernel(rows_ref, cols_ref, valid_ref, adj_ref, sup_ref,
                             out_ref, *, steps, tk, active, sup_resident):
    g = pl.program_id(0)
    b = pl.program_id(1)
    i = g * steps + b
    row = rows_ref[i]
    is_first = jnp.logical_or(b == 0, rows_ref[jnp.maximum(i - 1, 0)] != row)

    @pl.when(is_first)
    def _():
        out_ref[...] = jnp.zeros_like(out_ref)

    @pl.when(valid_ref[i] != 0)
    def _():
        adj_tile = adj_ref[...].astype(jnp.bfloat16)
        if sup_resident:
            col = cols_ref[i]
            sup_tile = sup_ref[pl.ds(pl.multiple_of(col * tk, tk), tk), :]
        else:
            sup_tile = sup_ref[...]
        out_ref[...] += jnp.dot(adj_tile, sup_tile,
                                preferred_element_type=jnp.float32)

    if active:
        total = pl.num_programs(0) * steps
        is_last = jnp.logical_or(b == steps - 1,
                                 rows_ref[jnp.minimum(i + 1, total - 1)] != row)

        @pl.when(is_last)
        def _():
            out_ref[...] = jnp.maximum(out_ref[...], 0.0)


def _aggregate_block_sparse(adj, support_bf, structure, *, active,
                            sup_resident):
    n = adj.shape[0]
    f_out = support_bf.shape[1]
    tm, tk, steps = structure.tm, structure.tk, structure.steps
    kernel = functools.partial(_aggregate_sparse_kernel, steps=steps, tk=tk,
                               active=active, sup_resident=sup_resident)

    def adj_map(g, b, rows, cols, valid):
        i = g * steps + b
        return (rows[i], cols[i])

    def out_map(g, b, rows, cols, valid):
        return (rows[g * steps + b], 0)

    if sup_resident:
        sup_spec = pl.BlockSpec((n, f_out),
                                lambda g, b, rows, cols, valid: (0, 0))
    else:
        sup_spec = pl.BlockSpec(
            (tk, f_out),
            lambda g, b, rows, cols, valid: (cols[g * steps + b], 0))

    return pl.pallas_call(
        kernel,
        out_shape=jax.ShapeDtypeStruct((n, f_out), jnp.float32),
        grid_spec=pltpu.PrefetchScalarGridSpec(
            num_scalar_prefetch=3,                 # rows, cols, valid -> SMEM
            grid=(structure.num_groups, steps),
            in_specs=[pl.BlockSpec((tm, tk), adj_map), sup_spec],
            out_specs=pl.BlockSpec((tm, f_out), out_map),
        ),
        compiler_params=pltpu.CompilerParams(
            # Groups own disjoint row blocks -> the group axis is safely
            # parallel (uses both TensorCores on v7x).
            dimension_semantics=("parallel", "arbitrary"),
            vmem_limit_bytes=_VMEM_LIMIT_BYTES),
    )(structure.rows, structure.cols, structure.valid, adj, support_bf)


# --------------------------------------------------------------------------
# Host-side helpers
# --------------------------------------------------------------------------
def _vmem_bytes(n, f_out, tm, tk, adj_itemsize, sup_resident):
    adj = 2 * tm * tk * adj_itemsize                           # double-buffered adj tile
    sup = (2 * n * f_out * 2) if sup_resident else (2 * tk * f_out * 2)
    out = 2 * tm * f_out * 4                                   # resident f32 output tile
    return adj + sup + out


def _pick_tiles(n, f_out, adj_itemsize, sup_resident):
    # tm: keep >= 2 row tiles when possible so the 'parallel' row axis can
    # still split across v7x's two TensorCores.
    tm = next((c for c in (512, 256, 128) if n % c == 0 and n // c >= 2), n)
    # tk: large reduction tile (>= ~1 MiB of adj per grid step) to amortize the
    # ~0.35 us fixed per-step overhead; shrink only if VMEM budget is exceeded.
    tk = next((c for c in (2048, 1024, 512, 256, 128) if n % c == 0), n)

    def fits(tm_, tk_):
        return _vmem_bytes(n, f_out, tm_, tk_, adj_itemsize,
                           sup_resident) <= _VMEM_BUDGET_BYTES

    while not fits(tm, tk) and tk >= 256 and tk % 2 == 0 and n % (tk // 2) == 0:
        tk //= 2
    while not fits(tm, tk) and tm >= 256 and tm % 2 == 0 and n % (tm // 2) == 0:
        tm //= 2
    return tm, tk


def gnn_layer(features, adj, weight, active=True, *,
              block_structure=None, block_sparse_threshold=0.5,
              tm=None, tk=None):
    """output = relu(adj @ (features @ weight)) if active else adj @ (features @ weight).

    All inputs are streamed in their native dtype (per-tile bf16 cast happens
    in VMEM).  Passing a bf16 adjacency halves the dominant HBM stream across
    layers.  `block_structure` (precompute_block_structure, once per graph)
    enables skipping all-zero adjacency blocks; it is only used when its
    block-level nonzero fraction is at or below `block_sparse_threshold`.
    """
    n, f_in = features.shape
    f_out = weight.shape[1]
    assert adj.shape == (n, n) and weight.shape[0] == f_in

    # Stage 1: support = features @ W, computed exactly once (bf16 output).
    support_bf = _support_matmul(features, weight)

    adj_itemsize = jnp.dtype(adj.dtype).itemsize
    sup_resident = (2 * n * f_out * 2) <= _SUPPORT_RESIDENT_BUDGET

    use_sparse = (block_structure is not None and
                  block_structure.nz_frac <= block_sparse_threshold)
    if use_sparse:
        s = block_structure
        assert n % s.tm == 0 and n % s.tk == 0
        vmem = _vmem_bytes(n, f_out, s.tm, s.tk, adj_itemsize, sup_resident)
        assert vmem <= _VMEM_BUDGET_BYTES, vmem
        return _aggregate_block_sparse(adj, support_bf, s, active=bool(active),
                                       sup_resident=sup_resident)

    auto_tm, auto_tk = _pick_tiles(n, f_out, adj_itemsize, sup_resident)
    tm = auto_tm if tm is None else tm
    tk = auto_tk if tk is None else tk
    assert n % tm == 0 and n % tk == 0  # TODO(synk): pad ragged graph sizes.
    vmem = _vmem_bytes(n, f_out, tm, tk, adj_itemsize, sup_resident)
    assert vmem <= _VMEM_BUDGET_BYTES, vmem
    return _aggregate_dense(adj, support_bf, tm=tm, tk=tk, active=bool(active),
                            sup_resident=sup_resident)


# --------------------------------------------------------------------------
# Demo / self-test
# --------------------------------------------------------------------------
def _xavier_uniform(key, shape, dtype=jnp.float32):
    fan_in, fan_out = shape
    limit = (6.0 / (fan_in + fan_out)) ** 0.5
    return jax.random.uniform(key, shape, dtype, minval=-limit, maxval=limit)


def _reference(features, adj, weight, active):
    # Reference with the same bf16-tile / f32-accumulate numerics as the kernels.
    support = jnp.dot(features.astype(jnp.bfloat16),
                      weight.astype(jnp.bfloat16),
                      preferred_element_type=jnp.float32).astype(jnp.bfloat16)
    out = jnp.dot(adj.astype(jnp.bfloat16), support,
                  preferred_element_type=jnp.float32)
    return jnp.maximum(out, 0.0) if active else out


if __name__ == "__main__":
    key = jax.random.PRNGKey(0)
    k_feat, k_adj, k_w, k_feat2, k_adj2 = jax.random.split(key, 5)

    F_IN, F_OUT = 64, 128
    weight = _xavier_uniform(k_w, (F_IN, F_OUT))

    # --- Case 1: random ~10%-dense adjacency -> dense aggregation path. ---
    N1 = 256
    features1 = jax.random.normal(k_feat, (N1, F_IN), dtype=jnp.float32)
    raw1 = jax.random.uniform(k_adj, (N1, N1), dtype=jnp.float32)
    adj1 = jnp.where(raw1 > 0.9, raw1, 0.0) + jnp.eye(N1, dtype=jnp.float32)
    adj1 = adj1 / jnp.sum(adj1, axis=1, keepdims=True)

    out1 = jax.block_until_ready(gnn_layer(features1, adj1, weight, active=True))
    ref1 = _reference(features1, adj1, weight, active=True)
    assert out1.shape == (N1, F_OUT) and out1.dtype == jnp.float32
    assert jnp.allclose(out1, ref1, atol=1e-2, rtol=1e-2)

    # --- Case 2: community-structured adjacency -> block-sparse path with a
    #     PER-GRAPH precomputed structure (computed once, reused), active=False.
    N2, COMM = 512, 256
    features2 = jax.random.normal(k_feat2, (N2, F_IN), dtype=jnp.float32)
    raw2 = jax.random.uniform(k_adj2, (N2, N2), dtype=jnp.float32)
    comm = jnp.arange(N2) // COMM
    same_comm = comm[:, None] == comm[None, :]
    adj2 = jnp.where(same_comm & (raw2 > 0.8), raw2, 0.0)
    adj2 = adj2 + jnp.eye(N2, dtype=jnp.float32)
    adj2 = adj2 / jnp.sum(adj2, axis=1, keepdims=True)

    structure2 = precompute_block_structure(adj2, tm=256, tk=256)  # once per graph
    assert structure2.nz_frac <= 0.5
    out2 = jax.block_until_ready(
        gnn_layer(features2, adj2, weight, active=False,
                  block_structure=structure2))
    ref2 = _reference(features2, adj2, weight, active=False)
    assert out2.shape == (N2, F_OUT) and out2.dtype == jnp.float32
    assert jnp.allclose(out2, ref2, atol=1e-2, rtol=1e-2)

    print("KERNEL_OK")
</pallas_src>

<mosaic_0001>
module attributes {stable_mosaic.version = 11 : i64} {
  func.func @_support_kernel(%arg0: i32, %arg1: memref<256x64xf32, #tpu.memory_space<vmem>>, %arg2: memref<64x128xf32, #tpu.memory_space<vmem>>, %arg3: memref<256x128xbf16, #tpu.memory_space<vmem>>) attributes {dimension_semantics = [#tpu.dimension_semantics<parallel>], iteration_bounds = array<i64: 1>, scalar_prefetch = 0 : i64, scratch_operands = 0 : i64, tpu.core_type = #tpu.core_type<tc>, window_params = [{transform_indices = @transform_0, window_bounds = array<i64: 256, 64>}, {pipeline_mode = #tpu.pipeline_mode<synchronous>, transform_indices = @transform_1, window_bounds = array<i64: 64, 128>}, {transform_indices = @transform_2, window_bounds = array<i64: 256, 128>}]} {
    %c0 = arith.constant 0 : index
    %c0_0 = arith.constant 0 : index
    %0 = vector.load %arg1[%c0, %c0_0] : memref<256x64xf32, #tpu.memory_space<vmem>>, vector<256x64xf32>
    %1 = arith.truncf %0 : vector<256x64xf32> to vector<256x64xbf16>
    %c0_1 = arith.constant 0 : index
    %c0_2 = arith.constant 0 : index
    %2 = vector.load %arg2[%c0_1, %c0_2] : memref<64x128xf32, #tpu.memory_space<vmem>>, vector<64x128xf32>
    %3 = arith.truncf %2 : vector<64x128xf32> to vector<64x128xbf16>
    %cst = arith.constant dense<0.000000e+00> : vector<256x128xf32>
    %4 = tpu.matmul %1, %3, %cst {dimension_numbers = #tpu.dot_dimension_numbers<[1], [0], [0], [1], [0, 0, 1, 1], [], []>} : vector<256x64xbf16>, vector<64x128xbf16>, vector<256x128xf32> -> vector<256x128xf32>
    %5 = arith.truncf %4 : vector<256x128xf32> to vector<256x128xbf16>
    %c0_3 = arith.constant 0 : index
    %c0_4 = arith.constant 0 : index
    %6 = vector.load %arg3[%c0_3, %c0_4] : memref<256x128xbf16, #tpu.memory_space<vmem>>, vector<256x128xbf16>
    tpu.vector_store %arg3[%c0_3, %c0_4], %5 {strides = array<i32>} : memref<256x128xbf16, #tpu.memory_space<vmem>>, vector<256x128xbf16>,
    return
  }
  func.func @transform_0(%arg0: i32) -> (i32, i32) {
    %c0_i32 = arith.constant 0 : i32
    %c0_i32_0 = arith.constant 0 : i32
    return %arg0, %c0_i32 : i32, i32
  }
  func.func @transform_1(%arg0: i32) -> (i32, i32) {
    %c0_i32 = arith.constant 0 : i32
    %c0_i32_0 = arith.constant 0 : i32
    %c0_i32_1 = arith.constant 0 : i32
    return %c0_i32, %c0_i32_0 : i32, i32
  }
  func.func @transform_2(%arg0: i32) -> (i32, i32) {
    %c0_i32 = arith.constant 0 : i32
    %c0_i32_0 = arith.constant 0 : i32
    return %arg0, %c0_i32 : i32, i32
  }
}

</mosaic_0001>

<bundles_post_ra>
// kernel: tpu_custom_call.1
= control target key start
LH: loop header
LB: loop body
LE: loop exit
PB: predicated region body
PF: predicated region fallthrough
CT: control target
= control target key end

     0   :  { %vm73_vm0 = vcmask 523264   ;;  %s895_s0 = inlined_call_operand.vmem [shape: f32[256,64], index: 0, kind: input, shape index: {}]   ;;  %s896_s1 = inlined_call_operand.vmem [shape: f32[64,128], index: 1, kind: input, shape index: {}]   ;;  %s897_s2 = inlined_call_operand.hbm [shape: bf16[256,128], index: 2, kind: output, shape index: {}]  }
   0x1   :  { %v61_v0 = vld [vmem:[%s896_s1] sm:$0xff]  ;;  %v62_v1 = vld [vmem:[%s896_s1 + $0x8] sm:$0xff]  ;;  %v63_v2 = vld [vmem:[%s896_s1 + $0x10] sm:$0xff] }
   0x2   :  { %v69_v3 = vpack.c.bf16 %v62_v1, %v61_v0  ;;  %v64_v4 = vld [vmem:[%s896_s1 + $0x18] sm:$0xff]  ;;  %v65_v6 = vld [vmem:[%s896_s1 + $0x20] sm:$0xff]  ;;  %v66_v7 = vld [vmem:[%s896_s1 + $0x28] sm:$0xff] }
   0x3   :  { %v70_v5 = vpack.c.bf16 %v64_v4, %v63_v2  ;;  %v13_v8 = vld [vmem:[%s895_s0] sm:$0xff]  ;;  %v14_v9 = vld [vmem:[%s895_s0 + $0x8] sm:$0xff]  ;;  %v71_v14 = vpack.c.bf16 %v66_v7, %v65_v6  ;;  %v67_v15 = vld [vmem:[%s896_s1 + $0x30] sm:$0xff] }
   0x4   :  { %654 = vmatprep.subr.bf16.mxu0 %v69_v3  ;;  %694 = vmatprep.subr.bf16.mxu1 %v69_v3  ;;  %v29_v10 = vld [vmem:[%s895_s0 + $0x80] sm:$0xff]  ;;  %v30_v11 = vld [vmem:[%s895_s0 + $0x88] sm:$0xff]  ;;  %v45_v12 = vpack.c.bf16 %v14_v9, %v13_v8  ;;  %v68_v16 = vld [vmem:[%s896_s1 + $0x38] sm:$0xff] }
   0x5   :  { %655 = vmatpush3.bf16.msra.mxu0 %v69_v3  ;;  %698 = vmatpush3.bf16.msra.mxu1 %v69_v3  ;;  %v53_v13 = vpack.c.bf16 %v30_v11, %v29_v10  ;;  %v72_v17 = vpack.c.bf16 %v68_v16, %v67_v15  ;;  %v15_v18 = vld [vmem:[%s895_s0 + $0x10] sm:$0xff]  ;;  %v16_v19 = vld [vmem:[%s895_s0 + $0x18] sm:$0xff]  ;;  %v17_v22 = vld [vmem:[%s895_s0 + $0x20] sm:$0xff] }
   0x6   :  { %656 = vmatprep.subr.bf16.mxu0 %v70_v5  ;;  %695 = vmatprep.subr.bf16.mxu1 %v70_v5  ;;  %v31_v20 = vld [vmem:[%s895_s0 + $0x90] sm:$0xff]  ;;  %v32_v21 = vld [vmem:[%s895_s0 + $0x98] sm:$0xff]  ;;  %v18_v23 = vld [vmem:[%s895_s0 + $0x28] sm:$0xff] }
   0x7   :  { %662 = vmatprep.mubr.msk.bf16.mxu0 %vm73_vm0, %v45_v12  ;;  %678 = vmatprep.mubr.msk.bf16.mxu1 %vm73_vm0, %v53_v13  ;;  %v33_v24 = vld [vmem:[%s895_s0 + $0xa0] sm:$0xff]  ;;  %v34_v25 = vld [vmem:[%s895_s0 + $0xa8] sm:$0xff] }
   0x9   :  { %657 = vmatpush3.bf16.msra.mxu0 %v70_v5  ;;  %699 = vmatpush3.bf16.msra.mxu1 %v70_v5 }
   0xa   :  { %658 = vmatprep.subr.bf16.mxu0 %v71_v14  ;;  %696 = vmatprep.subr.bf16.mxu1 %v71_v14 }
   0xd   :  { %659 = vmatpush3.bf16.msra.mxu0 %v71_v14  ;;  %700 = vmatpush3.bf16.msra.mxu1 %v71_v14 }
   0xe   :  { %660 = vmatprep.subr.bf16.mxu0 %v72_v17  ;;  %697 = vmatprep.subr.bf16.mxu1 %v72_v17 }
   0xf   :  { %7 = vsyncpa [#allocation3], 0  ;;  %v46_v26 = vpack.c.bf16 %v16_v19, %v15_v18  ;;  %v54_v27 = vpack.c.bf16 %v32_v21, %v31_v20  ;;  %v47_v28 = vpack.c.bf16 %v18_v23, %v17_v22  ;;  %v55_v29 = vpack.c.bf16 %v34_v25, %v33_v24  ;;  %v19_v30 = vld [vmem:[%s895_s0 + $0x30] sm:$0xff]  ;;  %v20_v31 = vld [vmem:[%s895_s0 + $0x38] sm:$0xff] }
  0x10   :  { %v35_v32 = vld [vmem:[%s895_s0 + $0xb0] sm:$0xff]  ;;  %v36_v33 = vld [vmem:[%s895_s0 + $0xb8] sm:$0xff]  ;;  %v21_v34 = vld [vmem:[%s895_s0 + $0x40] sm:$0xff]  ;;  %v48_v38 = vpack.c.bf16 %v20_v31, %v19_v30 }
  0x11   :  { %661 = vmatpush3.bf16.msra.mxu0 %v72_v17  ;;  %701 = vmatpush3.bf16.msra.mxu1 %v72_v17  ;;  %v22_v35 = vld [vmem:[%s895_s0 + $0x48] sm:$0xff]  ;;  %v37_v36 = vld [vmem:[%s895_s0 + $0xc0] sm:$0xff]  ;;  %v56_v39 = vpack.c.bf16 %v36_v33, %v35_v32  ;;  %v23_v42 = vld [vmem:[%s895_s0 + $0x50] sm:$0xff] }
  0x12   :  { %v38_v37 = vld [vmem:[%s895_s0 + $0xc8] sm:$0xff]  ;;  %v49_v40 = vpack.c.bf16 %v22_v35, %v21_v34  ;;  %v24_v43 = vld [vmem:[%s895_s0 + $0x58] sm:$0xff]  ;;  %v39_v44 = vld [vmem:[%s895_s0 + $0xd0] sm:$0xff] }
  0x13   :  { %v57_v41 = vpack.c.bf16 %v38_v37, %v37_v36  ;;  %v40_v45 = vld [vmem:[%s895_s0 + $0xd8] sm:$0xff]  ;;  %v25_v46 = vld [vmem:[%s895_s0 + $0x60] sm:$0xff]  ;;  %v26_v47 = vld [vmem:[%s895_s0 + $0x68] sm:$0xff]  ;;  %v50_v50 = vpack.c.bf16 %v24_v43, %v23_v42 }
  0x14   :  { %663 = vmatmul.mubr.msk.bf16.vlgmr.msra.gmra.mrb[0].mxu0 %vm73_vm0, %v46_v26  ;;  %679 = vmatmul.mubr.msk.bf16.vlgmr.msra.gmra.mrb[0].mxu1 %vm73_vm0, %v54_v27  ;;  %v41_v48 = vld [vmem:[%s895_s0 + $0xe0] sm:$0xff]  ;;  %v42_v49 = vld [vmem:[%s895_s0 + $0xe8] sm:$0xff]  ;;  %v58_v51 = vpack.c.bf16 %v40_v45, %v39_v44  ;;  %v51_v52 = vpack.c.bf16 %v26_v47, %v25_v46  ;;  %v27_v54 = vld [vmem:[%s895_s0 + $0x70] sm:$0xff] }
  0x15   :  { %666 = vmatprep.mubr.msk.bf16.mxu0 %vm73_vm0, %v47_v28  ;;  %682 = vmatprep.mubr.msk.bf16.mxu1 %vm73_vm0, %v55_v29  ;;  %v59_v53 = vpack.c.bf16 %v42_v49, %v41_v48  ;;  %v28_v55 = vld [vmem:[%s895_s0 + $0x78] sm:$0xff]  ;;  %v43_v56 = vld [vmem:[%s895_s0 + $0xf0] sm:$0xff] }
  0x16   :  { %v44_v57 = vld [vmem:[%s895_s0 + $0xf8] sm:$0xff]  ;;  %v52_v58 = vpack.c.bf16 %v28_v55, %v27_v54  ;;  %s729_s0 = smov [#allocation2]  }
  0x17   :  { %v60_v59 = vpack.c.bf16 %v44_v57, %v43_v56  ;;  %s448_s3 = sshll.u32 %s729_s0, 4  ;;  %s449_s3 = int_to_ptr.vmem [resolvable:$true] %s448_s3 }
  0x18   :  { %s705_s4 = scalar_lea.vmem %s449_s3, 2048  ;;  %p710_p1 = scmp.lt.s32.totalorder %s449_s3, %s449_s3 }
  0x19   :  { %p706_p0 = scmp.ne.s32.totalorder %s449_s3, %s705_s4  ;;  %p711_p2 = scmp.lt.s32.totalorder %s705_s4, %s705_s4 }
  0x1b   :  { %p712_p3 = por %p711_p2, %p710_p1 }
  0x1c   :  { %667 = vmatmul.mubr.msk.bf16.gmra.mrb[4].mxu0 %vm73_vm0, %v48_v38  ;;  %683 = vmatmul.mubr.msk.bf16.gmra.mrb[4].mxu1 %vm73_vm0, %v56_v39 }
  0x1d   :  { %670 = vmatprep.mubr.msk.bf16.mxu0 %vm73_vm0, %v49_v40  ;;  %686 = vmatprep.mubr.msk.bf16.mxu1 %vm73_vm0, %v57_v41  ;;  %p713_p4 = pnand %p712_p3, %p706_p0 }
  0x24   :  { %671 = vmatmul.mubr.msk.bf16.gmra.mrb[8].mxu0 %vm73_vm0, %v50_v50  ;;  %687 = vmatmul.mubr.msk.bf16.gmra.mrb[8].mxu1 %vm73_vm0, %v58_v51 }
  0x25   :  { %674 = vmatprep.mubr.msk.bf16.mxu0 %vm73_vm0, %v51_v52  ;;  %690 = vmatprep.mubr.msk.bf16.mxu1 %vm73_vm0, %v59_v53 }
  0x2c   :  { %675 = vmatmul.mubr.msk.bf16.gmra.mrb[12].mxu0 %vm73_vm0, %v52_v58  ;;  %691 = vmatmul.mubr.msk.bf16.gmra.mrb[12].mxu1 %vm73_vm0, %v60_v59 }
  0xe7   :  { %v664_v60 = vpop.f32.mrb[0].mxu0  ;;  %v680_v61 = vpop.f32.mrb[0].mxu1 }
  0xe8   :  { %v156_v62 = vpop.f32.mrb[1].mxu0  ;;  %v220_v63 = vpop.f32.mrb[1].mxu1 }
  0xe9   :  { %v665_v0 = vpop.f32.mrb[2].mxu0  ;;  %v681_v1 = vpop.f32.mrb[2].mxu1 }
  0xea   :  { %v547_v2 = vpack.c.bf16 %v665_v0, %v664_v60  ;;  %v587_v3 = vpack.c.bf16 %v681_v1, %v680_v61  ;;  %v159_v4 = vpop.f32.mrb[3].mxu0  ;;  %v223_v5 = vpop.f32.mrb[3].mxu1 }
  0xeb   :  { %v542_v6 = vpack.c.bf16 %v159_v4, %v156_v62  ;;  %v582_v7 = vpack.c.bf16 %v223_v5, %v220_v63 }
  0xec   :  { %619 = vst [vmem:[#allocation2 + $0x8] sm:$0xff] %v547_v2   ;;  %627 = vst [vmem:[#allocation2 + $0x48] sm:$0xff] %v587_v3  }
  0xed   :  { %543 = vst [vmem:[#allocation2] sm:$0xff] %v542_v6   ;;  %626 = vst [vmem:[#allocation2 + $0x40] sm:$0xff] %v582_v7  }
  0xef   :  { %v668_v8 = vpop.f32.mrb[4].mxu0  ;;  %v684_v9 = vpop.f32.mrb[4].mxu1 }
  0xf0   :  { %v172_v10 = vpop.f32.mrb[5].mxu0  ;;  %v236_v11 = vpop.f32.mrb[5].mxu1 }
  0xf1   :  { %v669_v12 = vpop.f32.mrb[6].mxu0  ;;  %v685_v13 = vpop.f32.mrb[6].mxu1 }
  0xf2   :  { %v557_v14 = vpack.c.bf16 %v669_v12, %v668_v8  ;;  %v597_v15 = vpack.c.bf16 %v685_v13, %v684_v9  ;;  %v175_v16 = vpop.f32.mrb[7].mxu0  ;;  %v239_v17 = vpop.f32.mrb[7].mxu1 }
  0xf3   :  { %v552_v18 = vpack.c.bf16 %v175_v16, %v172_v10  ;;  %v592_v19 = vpack.c.bf16 %v239_v17, %v236_v11 }
  0xf4   :  { %621 = vst [vmem:[#allocation2 + $0x18] sm:$0xff] %v557_v14   ;;  %629 = vst [vmem:[#allocation2 + $0x58] sm:$0xff] %v597_v15  }
  0xf5   :  { %620 = vst [vmem:[#allocation2 + $0x10] sm:$0xff] %v552_v18   ;;  %628 = vst [vmem:[#allocation2 + $0x50] sm:$0xff] %v592_v19  }
  0xf7   :  { %v672_v20 = vpop.f32.mrb[8].mxu0  ;;  %v688_v21 = vpop.f32.mrb[8].mxu1 }
  0xf8   :  { %v188_v22 = vpop.f32.mrb[9].mxu0  ;;  %v252_v23 = vpop.f32.mrb[9].mxu1 }
  0xf9   :  { %v673_v24 = vpop.f32.mrb[10].mxu0  ;;  %v689_v25 = vpop.f32.mrb[10].mxu1 }
  0xfa   :  { %v567_v26 = vpack.c.bf16 %v673_v24, %v672_v20  ;;  %v607_v27 = vpack.c.bf16 %v689_v25, %v688_v21  ;;  %v191_v28 = vpop.f32.mrb[11].mxu0  ;;  %v255_v29 = vpop.f32.mrb[11].mxu1 }
  0xfb   :  { %v562_v30 = vpack.c.bf16 %v191_v28, %v188_v22  ;;  %v602_v31 = vpack.c.bf16 %v255_v29, %v252_v23 }
  0xfc   :  { %623 = vst [vmem:[#allocation2 + $0x28] sm:$0xff] %v567_v26   ;;  %631 = vst [vmem:[#allocation2 + $0x68] sm:$0xff] %v607_v27  }
  0xfd   :  { %622 = vst [vmem:[#allocation2 + $0x20] sm:$0xff] %v562_v30   ;;  %630 = vst [vmem:[#allocation2 + $0x60] sm:$0xff] %v602_v31  }
  0xff   :  { %v676_v32 = vpop.f32.mrb[12].mxu0  ;;  %v692_v33 = vpop.f32.mrb[12].mxu1 }
 0x100   :  { %v204_v34 = vpop.f32.mrb[13].mxu0  ;;  %v268_v35 = vpop.f32.mrb[13].mxu1 }
 0x101   :  { %v677_v36 = vpop.f32.mrb[14].mxu0  ;;  %v693_v37 = vpop.f32.mrb[14].mxu1 }
 0x102   :  { %v577_v38 = vpack.c.bf16 %v677_v36, %v676_v32  ;;  %v617_v39 = vpack.c.bf16 %v693_v37, %v692_v33  ;;  %v207_v40 = vpop.f32.mrb[15].mxu0  ;;  %v271_v41 = vpop.f32.mrb[15].mxu1 }
 0x103   :  { %v572_v42 = vpack.c.bf16 %v207_v40, %v204_v34  ;;  %v612_v43 = vpack.c.bf16 %v271_v41, %v268_v35 }
 0x104   :  { %625 = vst [vmem:[#allocation2 + $0x38] sm:$0xff] %v577_v38   ;;  %633 = vst [vmem:[#allocation2 + $0x78] sm:$0xff] %v617_v39  }
 0x105   :  { %624 = vst [vmem:[#allocation2 + $0x30] sm:$0xff] %v572_v42   ;;  %632 = vst [vmem:[#allocation2 + $0x70] sm:$0xff] %v612_v43  }
 0x106   :  { %716 = shalt.err (!%p713_p4)
}
 0x107   :  { %s717_s7 = scalar_lea.hbm %s897_s2, 2048 }
 0x108   :  { %p718_p5 = scmp.ne.s32.totalorder %s897_s2, %s717_s7  ;;  %p721_p6 = scmp.lt.u32.totalorder %s717_s7, %s897_s2 }
 0x10a   :  { %p723_p7 = pnand %p721_p6, %p718_p5 }
 0x10c   :  { %726 = shalt.err (!%p723_p7)
}
 0x10d   :  { %s730_s11 = smov 64   ;;  %s731_s12 = smov 4  }
 0x10e   :  { %454 = dma.vmem_to_hbm [thread:$0]  %s449_s3, 2048, %s897_s2, [#allocation3], %s730_s11, %s730_s11, %s731_s12  }
 0x10f   :  { %727 = dma.done.wait [#allocation3], 2048  }
 0x110   :  { %728 = vsyncadd [#allocation3], 4294965248 }
 0x111   :  { %458 = vsyncpa [#allocation3], 1 }

</bundles_post_ra>
